<compile_context>
chip_gen: v7x
topology: tpu7x:2x2x1
jax: 0.10.0
libtpu: 0.0.40
codegen_flags: <defaults>
</compile_context>

<pallas_src>
import math

import numpy as np
import jax
import jax.numpy as jnp
from jax.experimental import pallas as pl
from jax.experimental.pallas import tpu as pltpu

BN_EPS = 1e-5
LANE = 128


def _round_up(x, m):
    return ((x + m - 1) // m) * m


def _pick_co_block(c_out):
    """Channels handled per grid step (the MXU M dimension)."""
    if c_out <= 8:
        return c_out
    # Two fat "parallel" steps (v7x megacore) only when each still fills M well.
    if c_out % 2 == 0 and (c_out // 2) % 8 == 0 and 128 <= c_out // 2 <= 256:
        return c_out // 2
    if c_out <= 256:
        return c_out                      # demo: C_out=16 -> a single grid step
    for d in range(256, 7, -8):           # largest multiple-of-8 divisor <= 256
        if c_out % d == 0:
            return d
    return c_out


def _make_kernel(KH, KW, Wp, C_in_pad, OFF, LDO, HAL, CO_BLK, n_valid):
    """Per-grid-step kernel. Closure over static layout constants."""
    taps = [(kh, kw) for kh in range(KH) for kw in range(KW)]
    inv_n = 1.0 / float(n_valid)

    def kernel(x_ref, w_ref, p_ref, m_ref, o_ref, col_ref, y_ref):
        # x_ref  : (C_in_pad, L)          bf16  padded-flat input, data at [OFF, OFF+LD)
        # w_ref  : (CO_BLK, 9*C_in_pad)   bf16  conv weights, tap-major along K
        # p_ref  : (CO_BLK, 8)            f32   [:,0]=bias [:,1]=gamma [:,2]=beta
        # m_ref  : (1, LDO)               f32   1.0 at interior (non-pad) lanes else 0.0
        # o_ref  : (CO_BLK, LDO)          f32   pooled output, lane-dense flat layout
        # col_ref: (9*C_in_pad, LDO)      bf16  scratch: im2col stack
        # y_ref  : (CO_BLK, LDO+HAL)      f32   scratch: ReLU output + zeroed tail halo

        # ---- im2col: fold the 9 conv taps into the matmul contraction axis.
        # (Rebuilt each step so it stays correct under "parallel"/megacore grid
        #  sharding; the demo grid has a single step so this runs exactly once.)
        for t, (kh, kw) in enumerate(taps):
            d = (kh - 1) * Wp + (kw - 1)                      # flat tap offset
            col_ref[t * C_in_pad:(t + 1) * C_in_pad, :] = (
                x_ref[:, OFF + d:OFF + d + LDO])              # sublane-aligned store

        # ---- Conv2d: one fat MXU matmul, f32 accumulation ----------------------
        acc = jnp.dot(w_ref[...], col_ref[...],
                      preferred_element_type=jnp.float32)     # (CO_BLK, LDO)
        prm = p_ref[...]
        acc = acc + prm[:, 0:1]                               # conv bias (per channel)

        # ---- BatchNorm2d (training): fused masked single-pass biased stats -----
        m = m_ref[...]                                        # (1, LDO) 0/1 mask
        am = acc * m
        mean = jnp.sum(am, axis=1, keepdims=True) * inv_n     # (CO_BLK, 1)
        var = jnp.sum(am * acc, axis=1, keepdims=True) * inv_n - mean * mean
        var = jnp.maximum(var, 0.0)                           # guard cancellation
        scale = prm[:, 1:2] * jax.lax.rsqrt(var + BN_EPS)
        shift = prm[:, 2:3] - mean * scale

        # ---- ReLU (mask forces pad ring + lane tail to 0 => 0 acts as -inf) ----
        y = jnp.maximum(acc * scale + shift, 0.0) * m         # (CO_BLK, LDO)

        # ---- MaxPool2d(k=2, s=1, p=1): scratch + 3 shifted loads, ONE store ----
        y_ref[:, :LDO] = y
        y_ref[:, LDO:] = jnp.zeros((CO_BLK, HAL), jnp.float32)
        p01 = y_ref[:, 1:1 + LDO]                             # y[r, c+1]
        p10 = y_ref[:, Wp:Wp + LDO]                           # y[r+1, c]
        p11 = y_ref[:, Wp + 1:Wp + 1 + LDO]                   # y[r+1, c+1]
        o_ref[...] = jnp.maximum(jnp.maximum(y, p01), jnp.maximum(p10, p11))
        # Dropout(p=0) is the identity.

    return kernel


def graph_equiv_cnn_submodule(x, w, b, gamma, beta):
    """x: (N, C_in, H, W) NCHW f32. Returns (N, C_out, H+1, W+1) NCHW f32."""
    N, C_in, H, W = x.shape
    C_out, c_in2, KH, KW = w.shape
    assert c_in2 == C_in
    # Module defaults only: kernel_size=3, stride=1, padding=1 (=> pool k=2,s=1,p=1).
    assert KH == 3 and KW == 3, "kernel assumes the module's default kernel_size=3"

    Hp, Wp = H + 2, W + 2
    P = Hp * Wp
    LD = N * P                                    # flat padded spatial length
    C_in_pad = _round_up(C_in, 8)                 # sublane-aligned im2col fills
    KN = KH * KW * C_in_pad                       # matmul contraction depth
    OFF = _round_up(Wp + 1, LANE)                 # left halo >= most-negative tap
    HAL = _round_up(Wp + 1, LANE)                 # right halo >= most-positive tap/pool
    LDO = _round_up(LD, LANE)                     # lane-dense matmul / output width
    L = OFF + LDO + HAL                           # flat input width (mult of 128)
    assert OFF >= Wp + 1 and HAL >= Wp + 1

    CO_BLK = _pick_co_block(C_out)
    if C_out % CO_BLK != 0:
        CO_BLK = C_out
    grid = (C_out // CO_BLK,)

    # TODO(synk): for very large N*H*W add a lane-axis grid dimension with a
    # two-pass BatchNorm (and Buffered(1) on the resident blocks) so the flattened
    # batch no longer has to be fully VMEM-resident.

    # ---- layout plumbing (tiny slabs): NCHW -> channel-major padded-flat -------
    xpad = jnp.pad(x.astype(jnp.float32),
                   ((0, 0), (0, C_in_pad - C_in), (1, 1), (1, 1)))
    xflat = jnp.transpose(xpad, (1, 0, 2, 3)).reshape(C_in_pad, LD)
    xflat = jnp.pad(xflat, ((0, 0), (OFF, L - OFF - LD))).astype(jnp.bfloat16)

    # conv weights flattened tap-major along K: w_flat[co, (kh*KW+kw)*C_in_pad + ci]
    w_p = jnp.pad(w.astype(jnp.float32),
                  ((0, 0), (0, C_in_pad - C_in), (0, 0), (0, 0)))
    w_flat = jnp.transpose(w_p, (0, 2, 3, 1)).reshape(C_out, KN).astype(jnp.bfloat16)

    # bias | gamma | beta packed into one small f32 input (one DMA per step)
    params = jnp.zeros((C_out, 8), jnp.float32)
    params = params.at[:, 0].set(b.astype(jnp.float32))
    params = params.at[:, 1].set(gamma.astype(jnp.float32))
    params = params.at[:, 2].set(beta.astype(jnp.float32))

    # interior (non-pad) mask of the flat layout -- a compile-time constant
    rr = np.arange(P) // Wp
    cc = np.arange(P) % Wp
    inner = ((rr >= 1) & (rr <= H) & (cc >= 1) & (cc <= W)).astype(np.float32)
    mask_np = np.zeros((1, LDO), np.float32)
    mask_np[0, :LD] = np.tile(inner, N)
    mask = jnp.asarray(mask_np)

    kernel = _make_kernel(KH, KW, Wp, C_in_pad, OFF, LDO, HAL, CO_BLK, N * H * W)

    # VMEM budget (double-buffered in/out blocks + scratch) and scheduling hint.
    vmem_est = (2 * (C_in_pad * L * 2 + CO_BLK * KN * 2 + CO_BLK * 8 * 4 + LDO * 4)
                + 2 * CO_BLK * LDO * 4
                + KN * LDO * 2 + CO_BLK * (LDO + HAL) * 4)
    vmem_limit = int(min(max(2 * vmem_est, 32 * 2 ** 20), 56 * 2 ** 20))
    cost = pl.CostEstimate(
        flops=2 * C_out * KN * LDO + 10 * C_out * LDO,
        transcendentals=C_out,
        bytes_accessed=(C_in_pad * L * 2 + C_out * KN * 2 + C_out * 8 * 4
                        + LDO * 4 + C_out * LDO * 4))

    out_flat = pl.pallas_call(
        kernel,
        grid=grid,
        in_specs=[
            pl.BlockSpec((C_in_pad, L), lambda i: (0, 0)),    # x stays VMEM-resident
            pl.BlockSpec((CO_BLK, KN), lambda i: (i, 0)),     # conv weights (flat K)
            pl.BlockSpec((CO_BLK, 8), lambda i: (i, 0)),      # bias | gamma | beta
            pl.BlockSpec((1, LDO), lambda i: (0, 0)),         # interior mask
        ],
        out_specs=pl.BlockSpec((CO_BLK, LDO), lambda i: (i, 0)),
        out_shape=jax.ShapeDtypeStruct((C_out, LDO), jnp.float32),
        scratch_shapes=[
            pltpu.VMEM((KN, LDO), jnp.bfloat16),              # im2col stack
            pltpu.VMEM((CO_BLK, LDO + HAL), jnp.float32),     # ReLU output + halo
        ],
        compiler_params=pltpu.CompilerParams(
            dimension_semantics=("parallel",),
            vmem_limit_bytes=vmem_limit),
        cost_estimate=cost,
    )(xflat, w_flat, params, mask)

    # ---- layout plumbing: flat (C_out, LDO) -> NCHW pooled (N, C_out, H+1, W+1) -
    out = out_flat[:, :LD].reshape(C_out, N, Hp, Wp)[:, :, :H + 1, :W + 1]
    return jnp.transpose(out, (1, 0, 2, 3))


def _reference_forward(x, w, b, gamma, beta):
    """Pure-JAX reference of the PyTorch forward (training-mode BN)."""
    y = jax.lax.conv_general_dilated(
        x, w, window_strides=(1, 1), padding=((1, 1), (1, 1)),
        dimension_numbers=("NCHW", "OIHW", "NCHW"),
        precision=jax.lax.Precision.HIGHEST)
    y = y + b[None, :, None, None]
    mean = jnp.mean(y, axis=(0, 2, 3), keepdims=True)
    var = jnp.mean(jnp.square(y - mean), axis=(0, 2, 3), keepdims=True)
    y = (y - mean) / jnp.sqrt(var + BN_EPS)
    y = y * gamma[None, :, None, None] + beta[None, :, None, None]
    y = jnp.maximum(y, 0.0)
    y = jax.lax.reduce_window(
        y, -jnp.inf, jax.lax.max,
        window_dimensions=(1, 1, 2, 2), window_strides=(1, 1, 1, 1),
        padding=((0, 0), (0, 0), (1, 1), (1, 1)))
    return y


if __name__ == "__main__":
    # Small demo shapes consistent with the module (in_channels=4, out_channels=16).
    N, C_in, C_out, H, W, K = 2, 4, 16, 16, 16, 3

    key = jax.random.PRNGKey(0)
    kx, kw, kb = jax.random.split(key, 3)

    x = jax.random.normal(kx, (N, C_in, H, W), dtype=jnp.float32)

    # Deterministic parameter init mirroring the PyTorch module's __init__:
    # kaiming_uniform_(mode='fan_in', nonlinearity='relu') -> U(+-sqrt(6/fan_in))
    fan_in = C_in * K * K
    w_bound = math.sqrt(6.0 / fan_in)
    w = jax.random.uniform(kw, (C_out, C_in, K, K), jnp.float32, -w_bound, w_bound)
    # Conv2d default bias init: U(+-1/sqrt(fan_in))
    b_bound = 1.0 / math.sqrt(fan_in)
    b = jax.random.uniform(kb, (C_out,), jnp.float32, -b_bound, b_bound)
    # BatchNorm2d affine defaults
    gamma = jnp.ones((C_out,), jnp.float32)
    beta = jnp.zeros((C_out,), jnp.float32)

    out = jax.jit(graph_equiv_cnn_submodule)(x, w, b, gamma, beta)
    out = jax.block_until_ready(out)
    assert out.shape == (N, C_out, H + 1, W + 1), out.shape

    # Tight check: reference fed the same bf16-rounded conv inputs the MXU sees
    # (accumulation is f32 in both, so this validates the kernel logic exactly).
    ref_bf16 = _reference_forward(
        x.astype(jnp.bfloat16).astype(jnp.float32),
        w.astype(jnp.bfloat16).astype(jnp.float32), b, gamma, beta)
    err_tight = float(jnp.max(jnp.abs(out - ref_bf16)))
    assert jnp.allclose(out, ref_bf16, atol=2e-3, rtol=2e-3), err_tight

    # Loose check: full-f32 reference; bf16 rounding of the conv inputs is the
    # only intended difference (review-endorsed MXU optimization).
    ref_f32 = _reference_forward(x, w, b, gamma, beta)
    err_loose = float(jnp.max(jnp.abs(out - ref_f32)))
    assert jnp.allclose(out, ref_f32, atol=5e-2, rtol=5e-2), err_loose

    print("KERNEL_OK")
</pallas_src>

<mosaic_0001>
module attributes {stable_mosaic.version = 11 : i64} {
  func.func @kernel(%arg0: i32, %arg1: memref<8x1024xbf16, #tpu.memory_space<vmem>>, %arg2: memref<16x72xbf16, #tpu.memory_space<vmem>>, %arg3: memref<16x8xf32, #tpu.memory_space<vmem>>, %arg4: memref<1x768xf32, #tpu.memory_space<vmem>>, %arg5: memref<16x768xf32, #tpu.memory_space<vmem>>, %arg6: memref<72x768xbf16, #tpu.memory_space<vmem>>, %arg7: memref<16x896xf32, #tpu.memory_space<vmem>>) attributes {dimension_semantics = [#tpu.dimension_semantics<parallel>], iteration_bounds = array<i64: 1>, scalar_prefetch = 0 : i64, scratch_operands = 2 : i64, tpu.core_type = #tpu.core_type<tc>, window_params = [{pipeline_mode = #tpu.pipeline_mode<synchronous>, transform_indices = @transform_0, window_bounds = array<i64: 8, 1024>}, {transform_indices = @transform_1, window_bounds = array<i64: 16, 72>}, {transform_indices = @transform_2, window_bounds = array<i64: 16, 8>}, {pipeline_mode = #tpu.pipeline_mode<synchronous>, transform_indices = @transform_3, window_bounds = array<i64: 1, 768>}, {transform_indices = @transform_4, window_bounds = array<i64: 16, 768>}]} {
    %c0 = arith.constant 0 : index
    %c109 = arith.constant 109 : index
    %0 = vector.load %arg1[%c0, %c109] : memref<8x1024xbf16, #tpu.memory_space<vmem>>, vector<8x768xbf16>
    %c0_0 = arith.constant 0 : index
    %c0_1 = arith.constant 0 : index
    %1 = vector.load %arg6[%c0_0, %c0_1] : memref<72x768xbf16, #tpu.memory_space<vmem>>, vector<8x768xbf16>
    tpu.vector_store %arg6[%c0_0, %c0_1], %0 {strides = array<i32>} : memref<72x768xbf16, #tpu.memory_space<vmem>>, vector<8x768xbf16>,
    %c0_2 = arith.constant 0 : index
    %c110 = arith.constant 110 : index
    %2 = vector.load %arg1[%c0_2, %c110] : memref<8x1024xbf16, #tpu.memory_space<vmem>>, vector<8x768xbf16>
    %c8 = arith.constant 8 : index
    %c0_3 = arith.constant 0 : index
    %3 = vector.load %arg6[%c8, %c0_3] : memref<72x768xbf16, #tpu.memory_space<vmem>>, vector<8x768xbf16>
    tpu.vector_store %arg6[%c8, %c0_3], %2 {strides = array<i32>} : memref<72x768xbf16, #tpu.memory_space<vmem>>, vector<8x768xbf16>,
    %c0_4 = arith.constant 0 : index
    %c111 = arith.constant 111 : index
    %4 = vector.load %arg1[%c0_4, %c111] : memref<8x1024xbf16, #tpu.memory_space<vmem>>, vector<8x768xbf16>
    %c16 = arith.constant 16 : index
    %c0_5 = arith.constant 0 : index
    %5 = vector.load %arg6[%c16, %c0_5] : memref<72x768xbf16, #tpu.memory_space<vmem>>, vector<8x768xbf16>
    tpu.vector_store %arg6[%c16, %c0_5], %4 {strides = array<i32>} : memref<72x768xbf16, #tpu.memory_space<vmem>>, vector<8x768xbf16>,
    %c0_6 = arith.constant 0 : index
    %c127 = arith.constant 127 : index
    %6 = vector.load %arg1[%c0_6, %c127] : memref<8x1024xbf16, #tpu.memory_space<vmem>>, vector<8x768xbf16>
    %c24 = arith.constant 24 : index
    %c0_7 = arith.constant 0 : index
    %7 = vector.load %arg6[%c24, %c0_7] : memref<72x768xbf16, #tpu.memory_space<vmem>>, vector<8x768xbf16>
    tpu.vector_store %arg6[%c24, %c0_7], %6 {strides = array<i32>} : memref<72x768xbf16, #tpu.memory_space<vmem>>, vector<8x768xbf16>,
    %c0_8 = arith.constant 0 : index
    %c128 = arith.constant 128 : index
    %8 = vector.load %arg1[%c0_8, %c128] : memref<8x1024xbf16, #tpu.memory_space<vmem>>, vector<8x768xbf16>
    %c32 = arith.constant 32 : index
    %c0_9 = arith.constant 0 : index
    %9 = vector.load %arg6[%c32, %c0_9] : memref<72x768xbf16, #tpu.memory_space<vmem>>, vector<8x768xbf16>
    tpu.vector_store %arg6[%c32, %c0_9], %8 {strides = array<i32>} : memref<72x768xbf16, #tpu.memory_space<vmem>>, vector<8x768xbf16>,
    %c0_10 = arith.constant 0 : index
    %c129 = arith.constant 129 : index
    %10 = vector.load %arg1[%c0_10, %c129] : memref<8x1024xbf16, #tpu.memory_space<vmem>>, vector<8x768xbf16>
    %c40 = arith.constant 40 : index
    %c0_11 = arith.constant 0 : index
    %11 = vector.load %arg6[%c40, %c0_11] : memref<72x768xbf16, #tpu.memory_space<vmem>>, vector<8x768xbf16>
    tpu.vector_store %arg6[%c40, %c0_11], %10 {strides = array<i32>} : memref<72x768xbf16, #tpu.memory_space<vmem>>, vector<8x768xbf16>,
    %c0_12 = arith.constant 0 : index
    %c145 = arith.constant 145 : index
    %12 = vector.load %arg1[%c0_12, %c145] : memref<8x1024xbf16, #tpu.memory_space<vmem>>, vector<8x768xbf16>
    %c48 = arith.constant 48 : index
    %c0_13 = arith.constant 0 : index
    %13 = vector.load %arg6[%c48, %c0_13] : memref<72x768xbf16, #tpu.memory_space<vmem>>, vector<8x768xbf16>
    tpu.vector_store %arg6[%c48, %c0_13], %12 {strides = array<i32>} : memref<72x768xbf16, #tpu.memory_space<vmem>>, vector<8x768xbf16>,
    %c0_14 = arith.constant 0 : index
    %c146 = arith.constant 146 : index
    %14 = vector.load %arg1[%c0_14, %c146] : memref<8x1024xbf16, #tpu.memory_space<vmem>>, vector<8x768xbf16>
    %c56 = arith.constant 56 : index
    %c0_15 = arith.constant 0 : index
    %15 = vector.load %arg6[%c56, %c0_15] : memref<72x768xbf16, #tpu.memory_space<vmem>>, vector<8x768xbf16>
    tpu.vector_store %arg6[%c56, %c0_15], %14 {strides = array<i32>} : memref<72x768xbf16, #tpu.memory_space<vmem>>, vector<8x768xbf16>,
    %c0_16 = arith.constant 0 : index
    %c147 = arith.constant 147 : index
    %16 = vector.load %arg1[%c0_16, %c147] : memref<8x1024xbf16, #tpu.memory_space<vmem>>, vector<8x768xbf16>
    %c64 = arith.constant 64 : index
    %c0_17 = arith.constant 0 : index
    %17 = vector.load %arg6[%c64, %c0_17] : memref<72x768xbf16, #tpu.memory_space<vmem>>, vector<8x768xbf16>
    tpu.vector_store %arg6[%c64, %c0_17], %16 {strides = array<i32>} : memref<72x768xbf16, #tpu.memory_space<vmem>>, vector<8x768xbf16>,
    %c0_18 = arith.constant 0 : index
    %c0_19 = arith.constant 0 : index
    %18 = vector.load %arg2[%c0_18, %c0_19] : memref<16x72xbf16, #tpu.memory_space<vmem>>, vector<16x72xbf16>
    %c0_20 = arith.constant 0 : index
    %c0_21 = arith.constant 0 : index
    %19 = vector.load %arg6[%c0_20, %c0_21] : memref<72x768xbf16, #tpu.memory_space<vmem>>, vector<72x768xbf16>
    %cst = arith.constant dense<0.000000e+00> : vector<16x768xf32>
    %20 = tpu.matmul %18, %19, %cst {dimension_numbers = #tpu.dot_dimension_numbers<[1], [0], [0], [1], [0, 0, 1, 1], [], []>} : vector<16x72xbf16>, vector<72x768xbf16>, vector<16x768xf32> -> vector<16x768xf32>
    %c0_22 = arith.constant 0 : index
    %c0_23 = arith.constant 0 : index
    %21 = vector.load %arg3[%c0_22, %c0_23] : memref<16x8xf32, #tpu.memory_space<vmem>>, vector<16x8xf32>
    %22 = vector.extract_strided_slice %21 {offsets = [0, 0], sizes = [16, 1], strides = [1, 1]} : vector<16x8xf32> to vector<16x1xf32>
    %23 = vector.broadcast %22 : vector<16x1xf32> to vector<16x768xf32>
    %24 = arith.addf %20, %23 : vector<16x768xf32>
    %c0_24 = arith.constant 0 : index
    %c0_25 = arith.constant 0 : index
    %25 = vector.load %arg4[%c0_24, %c0_25] : memref<1x768xf32, #tpu.memory_space<vmem>>, vector<1x768xf32>
    %26 = vector.broadcast %25 : vector<1x768xf32> to vector<16x768xf32>
    %27 = arith.mulf %24, %26 : vector<16x768xf32>
    %cst_26 = arith.constant dense<0.000000e+00> : vector<16xf32>
    %28 = vector.multi_reduction <add>, %27, %cst_26 [1] : vector<16x768xf32> to vector<16xf32>
    %29 = vector.shape_cast %28 : vector<16xf32> to vector<16x1xf32>
    %cst_27 = arith.constant 0.001953125 : f32
    %30 = vector.broadcast %cst_27 : f32 to vector<16x1xf32>
    %31 = arith.mulf %29, %30 : vector<16x1xf32>
    %32 = arith.mulf %27, %24 : vector<16x768xf32>
    %cst_28 = arith.constant dense<0.000000e+00> : vector<16xf32>
    %33 = vector.multi_reduction <add>, %32, %cst_28 [1] : vector<16x768xf32> to vector<16xf32>
    %34 = vector.shape_cast %33 : vector<16xf32> to vector<16x1xf32>
    %cst_29 = arith.constant 0.001953125 : f32
    %35 = vector.broadcast %cst_29 : f32 to vector<16x1xf32>
    %36 = arith.mulf %34, %35 : vector<16x1xf32>
    %37 = arith.mulf %31, %31 : vector<16x1xf32>
    %38 = arith.subf %36, %37 : vector<16x1xf32>
    %cst_30 = arith.constant 0.000000e+00 : f32
    %39 = vector.broadcast %cst_30 : f32 to vector<16x1xf32>
    %40 = arith.maximumf %38, %39 : vector<16x1xf32>
    %41 = vector.extract_strided_slice %21 {offsets = [0, 1], sizes = [16, 1], strides = [1, 1]} : vector<16x8xf32> to vector<16x1xf32>
    %cst_31 = arith.constant 9.99999974E-6 : f32
    %42 = vector.broadcast %cst_31 : f32 to vector<16x1xf32>
    %43 = arith.addf %40, %42 : vector<16x1xf32>
    %44 = math.rsqrt %43 : vector<16x1xf32>
    %45 = arith.mulf %41, %44 : vector<16x1xf32>
    %46 = vector.extract_strided_slice %21 {offsets = [0, 2], sizes = [16, 1], strides = [1, 1]} : vector<16x8xf32> to vector<16x1xf32>
    %47 = arith.mulf %31, %45 : vector<16x1xf32>
    %48 = arith.subf %46, %47 : vector<16x1xf32>
    %49 = vector.broadcast %45 : vector<16x1xf32> to vector<16x768xf32>
    %50 = arith.mulf %24, %49 : vector<16x768xf32>
    %51 = vector.broadcast %48 : vector<16x1xf32> to vector<16x768xf32>
    %52 = arith.addf %50, %51 : vector<16x768xf32>
    %cst_32 = arith.constant 0.000000e+00 : f32
    %53 = vector.broadcast %cst_32 : f32 to vector<16x768xf32>
    %54 = arith.maximumf %52, %53 : vector<16x768xf32>
    %55 = vector.broadcast %25 : vector<1x768xf32> to vector<16x768xf32>
    %56 = arith.mulf %54, %55 : vector<16x768xf32>
    %c0_33 = arith.constant 0 : index
    %c0_34 = arith.constant 0 : index
    %57 = vector.load %arg7[%c0_33, %c0_34] : memref<16x896xf32, #tpu.memory_space<vmem>>, vector<16x768xf32>
    tpu.vector_store %arg7[%c0_33, %c0_34], %56 {strides = array<i32>} : memref<16x896xf32, #tpu.memory_space<vmem>>, vector<16x768xf32>,
    %cst_35 = arith.constant 0.000000e+00 : f32
    %58 = vector.broadcast %cst_35 : f32 to vector<16x128xf32>
    %c0_36 = arith.constant 0 : index
    %c768 = arith.constant 768 : index
    %59 = vector.load %arg7[%c0_36, %c768] : memref<16x896xf32, #tpu.memory_space<vmem>>, vector<16x128xf32>
    tpu.vector_store %arg7[%c0_36, %c768], %58 {strides = array<i32>} : memref<16x896xf32, #tpu.memory_space<vmem>>, vector<16x128xf32>,
    %c0_37 = arith.constant 0 : index
    %c1 = arith.constant 1 : index
    %60 = vector.load %arg7[%c0_37, %c1] : memref<16x896xf32, #tpu.memory_space<vmem>>, vector<16x768xf32>
    %c0_38 = arith.constant 0 : index
    %c18 = arith.constant 18 : index
    %61 = vector.load %arg7[%c0_38, %c18] : memref<16x896xf32, #tpu.memory_space<vmem>>, vector<16x768xf32>
    %c0_39 = arith.constant 0 : index
    %c19 = arith.constant 19 : index
    %62 = vector.load %arg7[%c0_39, %c19] : memref<16x896xf32, #tpu.memory_space<vmem>>, vector<16x768xf32>
    %63 = arith.maximumf %56, %60 : vector<16x768xf32>
    %64 = arith.maximumf %61, %62 : vector<16x768xf32>
    %65 = arith.maximumf %63, %64 : vector<16x768xf32>
    %c0_40 = arith.constant 0 : index
    %c0_41 = arith.constant 0 : index
    %66 = vector.load %arg5[%c0_40, %c0_41] : memref<16x768xf32, #tpu.memory_space<vmem>>, vector<16x768xf32>
    tpu.vector_store %arg5[%c0_40, %c0_41], %65 {strides = array<i32>} : memref<16x768xf32, #tpu.memory_space<vmem>>, vector<16x768xf32>,
    return
  }
  func.func @transform_0(%arg0: i32) -> (i32, i32) {
    %c0_i32 = arith.constant 0 : i32
    %c0_i32_0 = arith.constant 0 : i32
    %c0_i32_1 = arith.constant 0 : i32
    return %c0_i32, %c0_i32_0 : i32, i32
  }
  func.func @transform_1(%arg0: i32) -> (i32, i32) {
    %c0_i32 = arith.constant 0 : i32
    %c0_i32_0 = arith.constant 0 : i32
    return %arg0, %c0_i32 : i32, i32
  }
  func.func @transform_2(%arg0: i32) -> (i32, i32) {
    %c0_i32 = arith.constant 0 : i32
    %c0_i32_0 = arith.constant 0 : i32
    return %arg0, %c0_i32 : i32, i32
  }
  func.func @transform_3(%arg0: i32) -> (i32, i32) {
    %c0_i32 = arith.constant 0 : i32
    %c0_i32_0 = arith.constant 0 : i32
    %c0_i32_1 = arith.constant 0 : i32
    return %c0_i32, %c0_i32_0 : i32, i32
  }
  func.func @transform_4(%arg0: i32) -> (i32, i32) {
    %c0_i32 = arith.constant 0 : i32
    %c0_i32_0 = arith.constant 0 : i32
    return %arg0, %c0_i32 : i32, i32
  }
}

</mosaic_0001>

<bundles_post_ra>
// kernel: graph_equiv_cnn_submodule.1
= control target key start
LH: loop header
LB: loop body
LE: loop exit
PB: predicated region body
PF: predicated region fallthrough
CT: control target
= control target key end

     0   :  { %s1090_s17 = smov 18   ;;  %s1091_s18 = smov 19   ;;  %v1097_v5 = vmov 0   ;;  %vm38_vm0 = vcmask 1043456   ;;  %vm40_vm1 = vcmask 154624   ;;  %vm73_vm2 = vcmask 146432   ;;  %s1562_s0 = inlined_call_operand.vmem [shape: bf16[8,1024], index: 0, kind: input, shape index: {}]   ;;  %s1563_s1 = inlined_call_operand.vmem [shape: bf16[16,72], index: 1, kind: input, shape index: {}]   ;;  %s1564_s2 = inlined_call_operand.vmem [shape: f32[16,8], index: 2, kind: input, shape index: {}]   ;;  %s1565_s3 = inlined_call_operand.vmem [shape: f32[1,768], index: 3, kind: input, shape index: {}]   ;;  %s1566_s4 = inlined_call_operand.vmem [shape: f32[16,768], index: 4, kind: output, shape index: {}]  }
   0x1   :  { %v52_v0 = vld [vmem:[%s1562_s0] sm:$0xff]  ;;  %v53_v1 = vld [vmem:[%s1562_s0 + $0x8] sm:$0xff]  ;;  %s1092_s21 = smov 17   ;;  %s1093_s22 = smov 1   ;;  %v54_v4 = vld [vmem:[%s1562_s0 + $0x10] sm:$0xff]  ;;  %525 = vmatprep.mubr.bf16.mxu0 %v1097_v5  ;;  %568 = vmatprep.mubr.bf16.mxu1 %v1097_v5  ;;  %vm106_vm3 = vcmask 138240  }
   0x2   :  { %60 = vrot.lane.b32.xlu1 %v52_v0, %s1090_s17  ;;  %26 = vrot.lane.b32.xlu0 %v52_v0, %s1091_s18  ;;  %v1144_v2 = vld [vmem:[%s1562_s0 + $0xc] sm:$0xff]  ;;  %v1149_v3 = vld [vmem:[%s1562_s0 + $0x4] sm:$0xff]  ;;  %s1094_s27 = smov 127   ;;  %s1095_s28 = smov 111   ;;  %vm139_vm4 = vcmask 7168   ;;  %vm178_vm5 = vcmask 1039360  }
   0x3   :  { %s1096_s29 = smov 110   ;;  %1070 = vset.pattern.permute.xlu1 %v1097_v5  ;;  %1069 = vset.pattern.permute.xlu0 %v1097_v5  ;;  %s1098_s6 = smov 109   ;;  %v55_v6 = vld [vmem:[%s1562_s0 + $0x18] sm:$0xf]  ;;  %v160_v10 = vld [vmem:[%s1562_s0 + $0x1c] sm:$0xf] }
   0x4   :  { %v21_v7 = vld [vmem:[%s1562_s0 + $0x18] sm:$0xf]  ;;  %v226_v12 = vld [vmem:[%s1562_s0 + $0x1c] sm:$0xf]  ;;  %v1222_v15 = vld [vmem:[%s1564_s2 + $0x8] sm:$0xff]  ;;  %vm211_vm6 = vcmask 908288  }
   0x5   :  { %v121_v8 = vld [vmem:[%s1562_s0 + $0x18] sm:$0xf]  ;;  %v193_v13 = vld [vmem:[%s1562_s0 + $0x1c] sm:$0xf]  ;;  %v1227_v16 = vld [vmem:[%s1564_s2] sm:$0xff]  ;;  %vm244_vm7 = vcmask 900096  }
   0x6   :  { %62 = vrot.lane.b32.xlu1 %v53_v1, %s1090_s17  ;;  %28 = vrot.lane.b32.xlu0 %v53_v1, %s1091_s18  ;;  %v88_v9 = vld [vmem:[%s1562_s0 + $0x18] sm:$0xf]  ;;  %v259_v14 = vld [vmem:[%s1562_s0 + $0x1c] sm:$0xf]  ;;  %vm277_vm8 = vcmask 891904   ;;  %vm470_vm9 = vcmask 588800  }
   0x7   :  { %v1198_v11 = vld [vmem:[%s1562_s0 + $0x14] sm:$0xff] }
   0xa   :  { %95 = vrot.lane.b32.xlu1 %v53_v1, %s1092_s21  ;;  %93 = vrot.lane.b32.xlu0 %v52_v0, %s1092_s21 }
   0xe   :  { %128 = vrot.lane.b32.xlu1 %v53_v1, %s1093_s22  ;;  %126 = vrot.lane.b32.xlu0 %v52_v0, %s1093_s22 }
  0x12   :  { %167 = vrot.lane.b32.xlu1 %v1144_v2, %s1094_s27  ;;  %165 = vrot.lane.b32.xlu0 %v1149_v3, %s1094_s27 }
  0x16   :  { %200 = vrot.lane.b32.xlu1 %v1144_v2, %s1095_s28  ;;  %198 = vrot.lane.b32.xlu0 %v1149_v3, %s1095_s28 }
  0x1a   :  { %233 = vrot.lane.b32.xlu1 %v1144_v2, %s1096_s29  ;;  %231 = vrot.lane.b32.xlu0 %v1149_v3, %s1096_s29 }
  0x1e   :  { %64 = vrot.lane.b32.xlu1 %v54_v4, %s1090_s17  ;;  %30 = vrot.lane.b32.xlu0 %v54_v4, %s1091_s18 }
  0x22   :  { %266 = vrot.lane.b32.xlu1 %v1144_v2, %s1098_s6  ;;  %264 = vrot.lane.b32.xlu0 %v1149_v3, %s1098_s6 }
  0x26   :  { %66 = vrot.lane.b32.xlu1 %v55_v6, %s1090_s17  ;;  %32 = vrot.lane.b32.xlu0 %v21_v7, %s1091_s18 }
  0x2a   :  { %130 = vrot.lane.b32.xlu1 %v54_v4, %s1093_s22  ;;  %97 = vrot.lane.b32.xlu0 %v54_v4, %s1092_s21 }
  0x2e   :  { %132 = vrot.lane.b32.xlu1 %v121_v8, %s1093_s22  ;;  %99 = vrot.lane.b32.xlu0 %v88_v9, %s1092_s21 }
  0x32   :  { %171 = vrot.lane.b32.xlu1 %v160_v10, %s1094_s27  ;;  %169 = vrot.lane.b32.xlu0 %v1198_v11, %s1094_s27 }
  0x36   :  { %235 = vrot.lane.b32.xlu1 %v1198_v11, %s1096_s29  ;;  %202 = vrot.lane.b32.xlu0 %v1198_v11, %s1095_s28 }
  0x3a   :  { %237 = vrot.lane.b32.xlu1 %v226_v12, %s1096_s29  ;;  %204 = vrot.lane.b32.xlu0 %v193_v13, %s1095_s28 }
  0x3e   :  { %270 = vrot.lane.b32.xlu1 %v259_v14, %s1098_s6  ;;  %268 = vrot.lane.b32.xlu0 %v1198_v11, %s1098_s6 }
  0x42   :  { %327 = vperm.xlu1 %1070, %v1222_v15   ;;  %322 = vperm.xlu0 %1069, %v1227_v16  }
  0x74   :  { %v61_v17 = vpop.permute.xlu1 %60  ;;  %v27_v18 = vpop.permute.xlu0 %26 }
  0x75   :  { %v68_v19 = vrot.slane %v61_v17, 4  ;;  %v34_v22 = vrot.slane %v27_v18, 4 }
  0x78   :  { %v1231_v20 = vpop.permute.xlu1 %62  ;;  %v1233_v21 = vpop.permute.xlu0 %28 }
  0x79   :  { %v69_v23 = vrot.slane %v1231_v20, 4  ;;  %v35_v24 = vrot.slane %v1233_v21, 4 }
  0x7b   :  { %v39_v25 = vsel %vm38_vm0, %v34_v22, %v35_v24  ;;  %v72_v26 = vsel %vm38_vm0, %v68_v19, %v69_v23 }
  0x7c   :  { %v1241_v27 = vpop.permute.xlu1 %95  ;;  %v94_v28 = vpop.permute.xlu0 %93  ;;  %v41_v29 = vsel %vm40_vm1, %v27_v18, %v39_v25  ;;  %v74_v30 = vsel %vm73_vm2, %v61_v17, %v72_v26 }
  0x7d   :  { %v102_v31 = vrot.slane %v1241_v27, 4  ;;  %v101_v32 = vrot.slane %v94_v28, 4  ;;  %v1022_v33 = vcombine.high %v41_v29, %v74_v30  ;;  %v1021_v34 = vcombine.low %v41_v29, %v74_v30 }
  0x7f   :  { %493 = vmatprep.subr.bf16.mxu0 %v1022_v33  ;;  %v105_v37 = vsel %vm38_vm0, %v101_v32, %v102_v31 }
  0x80   :  { %v1246_v35 = vpop.permute.xlu1 %128  ;;  %494 = vmatpush1.bf16.msra.mxu0 %v1021_v34  ;;  %v127_v36 = vpop.permute.xlu0 %126  ;;  %v107_v41 = vsel %vm106_vm3, %v94_v28, %v105_v37 }
  0x81   :  { %v135_v38 = vrot.slane %v1246_v35, 4  ;;  %v134_v39 = vrot.slane %v127_v36, 4 }
  0x83   :  { %v138_v40 = vsel %vm38_vm0, %v134_v39, %v135_v38 }
  0x84   :  { %v140_v42 = vsel %vm139_vm4, %v127_v36, %v138_v40  ;;  %v1257_v43 = vpop.permute.xlu1 %167  ;;  %v166_v44 = vpop.permute.xlu0 %165  ;;  %v1302_v36 = vld [vmem:[%s1563_s1] sm:$0xff]  }
  0x85   :  { %v1027_v45 = vcombine.low %v107_v41, %v140_v42  ;;  %v1028_v46 = vcombine.high %v107_v41, %v140_v42  ;;  %v174_v47 = vrot.slane %v1257_v43, 4  ;;  %v173_v48 = vrot.slane %v166_v44, 4 }
  0x87   :  { %v177_v49 = vsel %vm38_vm0, %v173_v48, %v174_v47  ;;  %495 = vmatprep.subr.bf16.mxu0 %v1028_v46 }
  0x88   :  { %v179_v50 = vsel %vm178_vm5, %v166_v44, %v177_v49  ;;  %v1264_v51 = vpop.permute.xlu1 %200  ;;  %496 = vmatpush1.bf16.msra.mxu0 %v1027_v45  ;;  %v199_v52 = vpop.permute.xlu0 %198 }
  0x89   :  { %v1033_v53 = vcombine.low %v1149_v3, %v179_v50  ;;  %v1034_v54 = vcombine.high %v1149_v3, %v179_v50  ;;  %v207_v55 = vrot.slane %v1264_v51, 4  ;;  %v206_v56 = vrot.slane %v199_v52, 4 }
  0x8b   :  { %497 = vmatprep.subr.bf16.mxu0 %v1034_v54  ;;  %v210_v59 = vsel %vm38_vm0, %v206_v56, %v207_v55 }
  0x8c   :  { %v1269_v57 = vpop.permute.xlu1 %233  ;;  %498 = vmatpush1.bf16.msra.mxu0 %v1033_v53  ;;  %v232_v58 = vpop.permute.xlu0 %231  ;;  %v212_v63 = vsel %vm211_vm6, %v199_v52, %v210_v59 }
  0x8d   :  { %v240_v60 = vrot.slane %v1269_v57, 4  ;;  %v239_v61 = vrot.slane %v232_v58, 4 }
  0x8f   :  { %v243_v62 = vsel %vm38_vm0, %v239_v61, %v240_v60 }
  0x90   :  { %v245_v0 = vsel %vm244_vm7, %v232_v58, %v243_v62  ;;  %v65_v1 = vpop.permute.xlu1 %64  ;;  %v31_v3 = vpop.permute.xlu0 %30 }
  0x91   :  { %v1039_v4 = vcombine.low %v212_v63, %v245_v0  ;;  %v1040_v6 = vcombine.high %v212_v63, %v245_v0  ;;  %v70_v7 = vrot.slane %v65_v1, 4  ;;  %v36_v8 = vrot.slane %v31_v3, 4 }
  0x93   :  { %499 = vmatprep.subr.bf16.mxu0 %v1040_v6  ;;  %v42_v9 = vsel %vm38_vm0, %v35_v24, %v36_v8  ;;  %v75_v10 = vsel %vm38_vm0, %v69_v23, %v70_v7 }
  0x94   :  { %v1284_v12 = vpop.permute.xlu1 %266  ;;  %500 = vmatpush1.bf16.msra.mxu0 %v1039_v4  ;;  %v265_v13 = vpop.permute.xlu0 %264  ;;  %v43_v14 = vsel %vm40_vm1, %v1233_v21, %v42_v9  ;;  %v76_v17 = vsel %vm73_vm2, %v1231_v20, %v75_v10 }
  0x95   :  { %v273_v18 = vrot.slane %v1284_v12, 4  ;;  %v272_v19 = vrot.slane %v265_v13, 4  ;;  %v1024_v22 = vcombine.high %v43_v14, %v76_v17  ;;  %v1023_v24 = vcombine.low %v43_v14, %v76_v17 }
  0x97   :  { %v276_v23 = vsel %vm38_vm0, %v272_v19, %v273_v18  ;;  %536 = vmatprep.subr.bf16.mxu1 %v1024_v22 }
  0x98   :  { %v278_v25 = vsel %vm277_vm8, %v265_v13, %v276_v23  ;;  %v67_v26 = vpop.permute.xlu1 %66  ;;  %537 = vmatpush1.bf16.msra.mxu1 %v1023_v24  ;;  %v33_v28 = vpop.permute.xlu0 %32 }
  0x99   :  { %v1045_v29 = vcombine.low %v278_v25, %v278_v25  ;;  %v1046_v21 = vcombine.high %v278_v25, %v278_v25  ;;  %v71_v30 = vrot.slane %v67_v26, 4  ;;  %v37_v32 = vrot.slane %v33_v28, 4 }
  0x9b   :  { %v77_v20 = vsel %vm38_vm0, %v70_v7, %v71_v30  ;;  %v44_v33 = vsel %vm38_vm0, %v36_v8, %v37_v32  ;;  %1051 = vmatprep.subr.msk.bf16.mxu0 %vm38_vm0, %v1046_v21  ;;  %v476_v34 = vsel %vm38_vm0, %v1045_v29, 0 }
  0x9c   :  { %v131_v37 = vpop.permute.xlu1 %130  ;;  %502 = vmatpush1.bf16.msra.mxu0 %v476_v34  ;;  %v98_v39 = vpop.permute.xlu0 %97  ;;  %v45_v40 = vsel %vm40_vm1, %v31_v3, %v44_v33  ;;  %v78_v41 = vsel %vm73_vm2, %v65_v1, %v77_v20 }
  0x9d   :  { %v136_v42 = vrot.slane %v131_v37, 4  ;;  %v103_v44 = vrot.slane %v98_v39, 4  ;;  %v1025_v45 = vcombine.low %v45_v40, %v78_v41  ;;  %v1026_v46 = vcombine.high %v45_v40, %v78_v41 }
  0x9f   :  { %v141_v48 = vsel %vm38_vm0, %v135_v38, %v136_v42  ;;  %v108_v49 = vsel %vm38_vm0, %v102_v31, %v103_v44  ;;  %579 = vmatprep.subr.bf16.mxu0 %v1026_v46  ;;  %1052 = vmatmul.mubr.msk.bf16.vlgmr.msra.gmra.mrb[0].mxu0 %vm470_vm9, %v1302_v36 }
  0xa0   :  { %v133_v50 = vpop.permute.xlu1 %132  ;;  %580 = vmatpush1.bf16.msra.mxu0 %v1025_v45  ;;  %v100_v52 = vpop.permute.xlu0 %99  ;;  %v109_v53 = vsel %vm106_vm3, %v1241_v27, %v108_v49  ;;  %v142_v54 = vsel %vm139_vm4, %v1246_v35, %v141_v48  ;;  %611 = vmatprep.mubr.bf16.mxu0 %v1097_v5 }
  0xa1   :  { %v137_v38 = vrot.slane %v133_v50, 4  ;;  %v104_v56 = vrot.slane %v100_v52, 4  ;;  %v1030_v58 = vcombine.high %v109_v53, %v142_v54  ;;  %v1029_v59 = vcombine.low %v109_v53, %v142_v54 }
  0xa2   :  { %v624_v54 = vlaneseq }
  0xa3   :  { %v143_v31 = vsel %vm38_vm0, %v136_v42, %v137_v38  ;;  %v110_v61 = vsel %vm38_vm0, %v103_v44, %v104_v56  ;;  %538 = vmatprep.subr.bf16.mxu1 %v1030_v58 }
  0xa4   :  { %v172_v62 = vpop.permute.xlu1 %171  ;;  %539 = vmatpush1.bf16.msra.mxu1 %v1029_v59  ;;  %v170_v63 = vpop.permute.xlu0 %169  ;;  %v111_v0 = vsel %vm106_vm3, %v98_v39, %v110_v61  ;;  %v144_v27 = vsel %vm139_vm4, %v131_v37, %v143_v31  ;;  %v625_v38 = vshrl.u32 %v624_v54, 7  ;;  %v622_v59 = vld [vmem:[%s1565_s3] sm:$0x3f] }
  0xa5   :  { %v176_v1 = vrot.slane %v172_v62, 4  ;;  %v175_v35 = vrot.slane %v170_v63, 4  ;;  %v1031_v3 = vcombine.low %v111_v0, %v144_v27  ;;  %v1032_v5 = vcombine.high %v111_v0, %v144_v27 }
  0xa6   :  { %v626_v56 = vsub.s32 0, %v625_v38  ;;  %v630_v58 = vsub.s32 1, %v625_v38 }
  0xa7   :  { %v180_v4 = vsel %vm38_vm0, %v174_v47, %v175_v35  ;;  %v182_v6 = vsel %vm38_vm0, %v175_v35, %v176_v1  ;;  %581 = vmatprep.subr.bf16.mxu0 %v1032_v5  ;;  %v634_v35 = vsub.s32 2, %v625_v38 }
  0xa8   :  { %v183_v7 = vsel %vm178_vm5, %v170_v63, %v182_v6  ;;  %v236_v8 = vpop.permute.xlu1 %235  ;;  %582 = vmatpush1.bf16.msra.mxu0 %v1031_v3  ;;  %v203_v9 = vpop.permute.xlu0 %202  ;;  %v181_v10 = vsel %vm178_vm5, %v1257_v43, %v180_v4  ;;  %v1366_v62 = vrot.slane %v622_v59, %v626_v56  ;;  %v1368_v63 = vrot.slane %v622_v59, %v630_v58 }
  0xa9   :  { %v1037_v13 = vcombine.low %v1198_v11, %v183_v7  ;;  %v1038_v14 = vcombine.high %v1198_v11, %v183_v7  ;;  %v241_v17 = vrot.slane %v236_v8, 4  ;;  %v208_v19 = vrot.slane %v203_v9, 4 }
  0xaa   :  { %v1036_v22 = vcombine.high %v1144_v2, %v181_v10  ;;  %v1035_v47 = vcombine.low %v1144_v2, %v181_v10  ;;  %v642_v4 = vsub.s32 4, %v625_v38  ;;  %v638_v6 = vsub.s32 3, %v625_v38 }
  0xab   :  { %v246_v24 = vsel %vm38_vm0, %v240_v60, %v241_v17  ;;  %v213_v23 = vsel %vm38_vm0, %v207_v55, %v208_v19  ;;  %583 = vmatprep.subr.bf16.mxu0 %v1038_v14  ;;  %v1386_v10 = vrot.slane %v622_v59, %v634_v35 }
  0xac   :  { %540 = vmatprep.subr.bf16.mxu1 %v1036_v22  ;;  %v238_v43 = vpop.permute.xlu1 %237  ;;  %584 = vmatpush1.bf16.msra.mxu0 %v1037_v13  ;;  %v205_v25 = vpop.permute.xlu0 %204  ;;  %v214_v11 = vsel %vm211_vm6, %v1264_v51, %v213_v23  ;;  %v247_v26 = vsel %vm244_vm7, %v1269_v57, %v246_v24  ;;  %v1390_v22 = vrot.slane %v622_v59, %v642_v4 }
  0xad   :  { %v242_v2 = vrot.slane %v238_v43, 4  ;;  %541 = vmatpush1.bf16.msra.mxu1 %v1035_v47  ;;  %v209_v28 = vrot.slane %v205_v25, 4  ;;  %v1042_v29 = vcombine.high %v214_v11, %v247_v26  ;;  %v1041_v60 = vcombine.low %v214_v11, %v247_v26 }
  0xae   :  { %v1392_v47 = vrot.slane %v622_v59, %v638_v6 }
  0xaf   :  { %v248_v21 = vsel %vm38_vm0, %v241_v17, %v242_v2  ;;  %v215_v55 = vsel %vm38_vm0, %v208_v19, %v209_v28  ;;  %542 = vmatprep.subr.bf16.mxu1 %v1042_v29 }
  0xb0   :  { %v271_v30 = vpop.permute.xlu1 %270  ;;  %v269_v32 = vpop.permute.xlu0 %268  ;;  %v216_v20 = vsel %vm211_vm6, %v203_v9, %v215_v55  ;;  %v249_v33 = vsel %vm244_vm7, %v236_v8, %v248_v21  ;;  %v646_v9 = vsub.s32 5, %v625_v38 }
  0xb1   :  { %v275_v51 = vrot.slane %v271_v30, 4  ;;  %543 = vmatpush1.bf16.msra.mxu1 %v1041_v60  ;;  %v274_v34 = vrot.slane %v269_v32, 4  ;;  %v1043_v57 = vcombine.low %v216_v20, %v249_v33  ;;  %v1044_v37 = vcombine.high %v216_v20, %v249_v33 }
  0xb2   :  { %v1398_v26 = vrot.slane %v622_v59, %v646_v9 }
  0xb3   :  { %v279_v39 = vsel %vm38_vm0, %v273_v18, %v274_v34  ;;  %v281_v40 = vsel %vm38_vm0, %v274_v34, %v275_v51  ;;  %585 = vmatprep.subr.bf16.mxu0 %v1044_v37 }
  0xb4   :  { %v282_v41 = vsel %vm277_vm8, %v269_v32, %v281_v40  ;;  %586 = vmatpush1.bf16.msra.mxu0 %v1043_v57  ;;  %v280_v42 = vsel %vm277_vm8, %v1284_v12, %v279_v39 }
  0xb5   :  { %v1049_v44 = vcombine.low %v282_v41, %v282_v41  ;;  %v1050_v45 = vcombine.high %v282_v41, %v282_v41  ;;  %v1048_v46 = vcombine.high %v280_v42, %v280_v42  ;;  %v1047_v48 = vcombine.low %v280_v42, %v280_v42 }
  0xb7   :  { %1053 = vmatprep.subr.msk.bf16.mxu1 %vm38_vm0, %v1048_v46  ;;  %1055 = vmatprep.subr.msk.bf16.mxu0 %vm38_vm0, %v1050_v45  ;;  %v482_v49 = vsel %vm38_vm0, %v1047_v48, 0  ;;  %v488_v18 = vsel %vm38_vm0, %v1049_v44, 0 }
  0xb8   :  { %545 = vmatpush1.bf16.msra.mxu1 %v482_v49  ;;  %588 = vmatpush1.bf16.msra.mxu0 %v488_v18 }
  0xbb   :  { %1054 = vmatmul.mubr.msk.bf16.vlgmr.msra.gmra.mrb[0].mxu1 %vm470_vm9, %v1302_v36  ;;  %1056 = vmatmul.mubr.msk.bf16.vlgmr.msra.gmra.mrb[4].mxu0 %vm470_vm9, %v1302_v36 }
  0xc1   :  { %v323_v31 = vpop.permute.xlu0 %322  ;;  %v328_v61 = vpop.permute.xlu1 %327 }
 0x172   :  { %v527_v12 = vpop.f32.mrb[0].mxu0 }
 0x173   :  { %v529_v50 = vpop.f32.mrb[1].mxu0  ;;  %v1370_v0 = vadd.f32 %v527_v12, %v323_v31 }
 0x174   :  { %v531_v52 = vpop.f32.mrb[2].mxu0  ;;  %v1372_v36 = vadd.f32 %v529_v50, %v323_v31 }
 0x175   :  { %v533_v53 = vpop.f32.mrb[3].mxu0  ;;  %v1374_v27 = vadd.f32 %v531_v52, %v328_v61  ;;  %v654_v3 = vmul.f32 %v1366_v62, %v1370_v0 }
 0x176   :  { %v1376_v1 = vadd.f32 %v533_v53, %v328_v61  ;;  %v655_v5 = vmul.f32 %v1368_v63, %v1372_v36 }
 0x177   :  { %v660_v7 = vmul.f32 %v1366_v62, %v1374_v27  ;;  %v682_v13 = vmul.f32 %v654_v3, %v1370_v0 }
 0x178   :  { %v661_v8 = vmul.f32 %v1368_v63, %v1376_v1  ;;  %v683_v14 = vmul.f32 %v655_v5, %v1372_v36  ;;  %v666_v28 = vadd.f32 %v655_v5, %v654_v3 }
 0x179   :  { %v688_v24 = vmul.f32 %v660_v7, %v1374_v27 }
 0x17a   :  { %v689_v23 = vmul.f32 %v661_v8, %v1376_v1  ;;  %v673_v2 = vadd.f32 %v661_v8, %v660_v7  ;;  %v694_v32 = vadd.f32 %v683_v14, %v682_v13 }
 0x17c   :  { %v701_v41 = vadd.f32 %v689_v23, %v688_v24  ;;  %v1099_v24 = vmov 1  }
 0x17d   :  { %1071 = vset.pattern.permute.xlu1 %v1099_v24  ;;  %1072 = vset.pattern.permute.xlu0 %v1099_v24 }
 0x18e   :  { %v570_v17 = vpop.f32.mrb[0].mxu1  ;;  %v613_v19 = vpop.f32.mrb[4].mxu0 }
 0x18f   :  { %v1396_v43 = vadd.f32 %v570_v17, %v323_v31  ;;  %v572_v25 = vpop.f32.mrb[1].mxu1  ;;  %v615_v11 = vpop.f32.mrb[5].mxu0  ;;  %v1400_v29 = vadd.f32 %v613_v19, %v323_v31 }
 0x190   :  { %v1402_v60 = vadd.f32 %v572_v25, %v323_v31  ;;  %v574_v21 = vpop.f32.mrb[2].mxu1  ;;  %v617_v55 = vpop.f32.mrb[6].mxu0  ;;  %v1412_v37 = vadd.f32 %v615_v11, %v323_v31 }
 0x191   :  { %v656_v30 = vmul.f32 %v1386_v10, %v1396_v43  ;;  %v1406_v20 = vadd.f32 %v574_v21, %v328_v61  ;;  %v1408_v33 = vadd.f32 %v617_v55, %v328_v61  ;;  %v576_v51 = vpop.f32.mrb[3].mxu1  ;;  %v619_v34 = vpop.f32.mrb[7].mxu0  ;;  %v658_v46 = vmul.f32 %v1390_v22, %v1400_v29 }
 0x192   :  { %v657_v57 = vmul.f32 %v1392_v47, %v1402_v60  ;;  %v1414_v39 = vadd.f32 %v576_v51, %v328_v61  ;;  %v1416_v40 = vadd.f32 %v619_v34, %v328_v61  ;;  %v659_v38 = vmul.f32 %v1398_v26, %v1412_v37 }
 0x193   :  { %v667_v42 = vadd.f32 %v666_v28, %v656_v30  ;;  %v684_v44 = vmul.f32 %v656_v30, %v1396_v43  ;;  %v662_v45 = vmul.f32 %v1386_v10, %v1406_v20  ;;  %v664_v49 = vmul.f32 %v1390_v22, %v1408_v33 }
 0x194   :  { %v685_v48 = vmul.f32 %v657_v57, %v1402_v60  ;;  %v663_v18 = vmul.f32 %v1392_v47, %v1414_v39  ;;  %v665_v56 = vmul.f32 %v1398_v26, %v1416_v40  ;;  %v686_v35 = vmul.f32 %v658_v46, %v1400_v29 }
 0x195   :  { %v695_v12 = vadd.f32 %v694_v32, %v684_v44  ;;  %v674_v50 = vadd.f32 %v673_v2, %v662_v45  ;;  %v690_v52 = vmul.f32 %v662_v45, %v1406_v20  ;;  %v668_v53 = vadd.f32 %v667_v42, %v657_v57 }
 0x196   :  { %v691_v54 = vmul.f32 %v663_v18, %v1414_v39  ;;  %v692_v3 = vmul.f32 %v664_v49, %v1408_v33  ;;  %v693_v8 = vmul.f32 %v665_v56, %v1416_v40  ;;  %v687_v17 = vmul.f32 %v659_v38, %v1412_v37 }
 0x197   :  { %v702_v58 = vadd.f32 %v701_v41, %v690_v52  ;;  %v669_v59 = vadd.f32 %v668_v53, %v658_v46  ;;  %v675_v31 = vadd.f32 %v674_v50, %v663_v18  ;;  %v696_v61 = vadd.f32 %v695_v12, %v685_v48 }
 0x198   :  { %v1100_v52 = vmov 2   ;;  %v1101_v53 = vmov 0.0  }
 0x199   :  { %v670_v5 = vadd.f32 %v669_v59, %v659_v38  ;;  %v676_v4 = vadd.f32 %v675_v31, %v664_v49  ;;  %v703_v6 = vadd.f32 %v702_v58, %v691_v54  ;;  %v697_v13 = vadd.f32 %v696_v61, %v686_v35 }
 0x19b   :  { %671 = vadd.xlane.f32.xlu1 %v670_v5  ;;  %v677_v7 = vadd.f32 %v676_v4, %v665_v56  ;;  %v704_v9 = vadd.f32 %v703_v6, %v692_v3  ;;  %v698_v19 = vadd.f32 %v697_v13, %v687_v17 }
 0x19d   :  { %678 = vadd.xlane.f32.xlu0 %v677_v7  ;;  %v705_v14 = vadd.f32 %v704_v9, %v693_v8 }
 0x19f   :  { %706 = vadd.xlane.f32.xlu1 %v705_v14 }
 0x1a1   :  { %699 = vadd.xlane.f32.xlu0 %v698_v19 }
 0x228   :  { %v672_v23 = vpop.xlane.xlu1 %671 }
 0x229   :  { %v680_v11 = vmul.f32 0.001953125, %v672_v23 }
 0x22a   :  { %v679_v25 = vpop.xlane.xlu0 %678 }
 0x22b   :  { %v681_v2 = vmul.f32 0.001953125, %v679_v25  ;;  %v710_v32 = vmul.f32 %v680_v11, %v680_v11 }
 0x22c   :  { %v707_v28 = vpop.xlane.xlu1 %706 }
 0x22d   :  { %v711_v21 = vmul.f32 %v681_v2, %v681_v2  ;;  %v709_v55 = vmul.f32 0.001953125, %v707_v28 }
 0x22e   :  { %v700_v30 = vpop.xlane.xlu0 %699 }
 0x22f   :  { %v713_v51 = vsub.f32 %v709_v55, %v711_v21  ;;  %v708_v34 = vmul.f32 0.001953125, %v700_v30 }
 0x231   :  { %v715_v57 = vmax.f32 %v713_v51, 0.0  ;;  %v712_v41 = vsub.f32 %v708_v34, %v710_v32 }
 0x233   :  { %v717_v42 = vadd.f32 1e-05, %v715_v57  ;;  %v714_v44 = vmax.f32 %v712_v41, 0.0 }
 0x235   :  { %1086 = vrsqrt.f32 %v717_v42  ;;  %v716_v45 = vadd.f32 1e-05, %v714_v44 }
 0x237   :  { %1088 = vrsqrt.f32 %v716_v45 }
 0x23f   :  { %v1087_v46 = vpop.eup %1086 }
 0x240   :  { %v721_v48 = vmul.f32 %v1087_v46, %v1222_v15 }
 0x241   :  { %v1089_v49 = vpop.eup %1088 }
 0x242   :  { %v723_v18 = vmul.f32 %v721_v48, %v681_v2  ;;  %v720_v12 = vmul.f32 %v1089_v49, %v1227_v16 }
 0x244   :  { %728 = vrot.lane.b32.xlu1 %v723_v18, %s1093_s22  ;;  %v722_v50 = vmul.f32 %v720_v12, %v680_v11 }
 0x246   :  { %726 = vrot.lane.b32.xlu0 %v722_v50, %s1093_s22 }
 0x248   :  { %736 = vperm.xlu1 %1071, %v720_v12  }
 0x24a   :  { %741 = vperm.xlu0 %1072, %v721_v48  }
 0x24c   :  { %1073 = vset.pattern.permute.xlu1 %v1100_v52 }
 0x24e   :  { %1075 = vrot.lane.b32.xlu0 %v1101_v53, %s1094_s27 }
 0x24f   :  { %1084 = vset.pattern.permute.xlu0 %v1100_v52 }
 0x2b6   :  { %v729_v56 = vpop.permute.xlu1 %728 }
 0x2b7   :  { %v733_v58 = vsub.f32 %v1222_v15, %v729_v56 }
 0x2b8   :  { %v727_v54 = vpop.permute.xlu0 %726 }
 0x2b9   :  { %v732_v38 = vsub.f32 %v1227_v16, %v727_v54 }
 0x2bb   :  { %758 = vperm.xlu1 %1073, %v732_v38  }
 0x2bf   :  { %763 = vperm.xlu1 %1073, %v733_v58  }
 0x2c7   :  { %v737_v59 = vpop.permute.xlu1 %736 }
 0x2c8   :  { %v745_v31 = vmul.f32 %v737_v59, %v1372_v36  ;;  %v744_v61 = vmul.f32 %v737_v59, %v1370_v0  ;;  %v747_v35 = vmul.f32 %v737_v59, %v1402_v60  ;;  %v746_v3 = vmul.f32 %v737_v59, %v1396_v43 }
 0x2c9   :  { %v749_v16 = vmul.f32 %v737_v59, %v1412_v37  ;;  %v748_v9 = vmul.f32 %v737_v59, %v1400_v29  ;;  %v742_v14 = vpop.permute.xlu0 %741 }
 0x2ca   :  { %v751_v29 = vmul.f32 %v742_v14, %v1376_v1  ;;  %v750_v37 = vmul.f32 %v742_v14, %v1374_v27  ;;  %v753_v55 = vmul.f32 %v742_v14, %v1414_v39  ;;  %v752_v30 = vmul.f32 %v742_v14, %v1406_v20 }
 0x2cb   :  { %v755_v41 = vmul.f32 %v742_v14, %v1416_v40  ;;  %v754_v42 = vmul.f32 %v742_v14, %v1408_v33 }
 0x2cd   :  { %v1472_v45 = vpop.permute.xlu0 %1075 }
 0x2ce   :  { %v1078_v33 = vunpack.i.h.bf16 %v1472_v45  ;;  %v1077_v40 = vunpack.i.l.bf16 %v1472_v45 }
 0x33a   :  { %v759_v5 = vpop.permute.xlu1 %758 }
 0x33b   :  { %v767_v4 = vadd.f32 %v759_v5, %v745_v31  ;;  %v766_v6 = vadd.f32 %v759_v5, %v744_v61  ;;  %v769_v7 = vadd.f32 %v759_v5, %v747_v35  ;;  %v768_v8 = vadd.f32 %v759_v5, %v746_v3 }
 0x33c   :  { %v771_v17 = vadd.f32 %v759_v5, %v749_v16  ;;  %v770_v36 = vadd.f32 %v759_v5, %v748_v9 }
 0x33d   :  { %v779_v15 = vmax.f32 %v767_v4, 0.0  ;;  %v778_v13 = vmax.f32 %v766_v6, 0.0  ;;  %v781_v43 = vmax.f32 %v769_v7, 0.0  ;;  %v780_v19 = vmax.f32 %v768_v8, 0.0 }
 0x33e   :  { %v764_v24 = vpop.permute.xlu1 %763  ;;  %v783_v23 = vmax.f32 %v771_v17, 0.0  ;;  %v782_v25 = vmax.f32 %v770_v36, 0.0 }
 0x33f   :  { %v1452_v0 = vmul.f32 %v779_v15, %v1368_v63  ;;  %v790_v60 = vmul.f32 %v778_v13, %v1366_v62  ;;  %v793_v11 = vmul.f32 %v781_v43, %v1392_v47  ;;  %v792_v2 = vmul.f32 %v780_v19, %v1386_v10 }
 0x340   :  { %v773_v28 = vadd.f32 %v764_v24, %v751_v29  ;;  %v772_v21 = vadd.f32 %v764_v24, %v750_v37  ;;  %v795_v1 = vmul.f32 %v783_v23, %v1398_v26  ;;  %v794_v27 = vmul.f32 %v782_v25, %v1390_v22 }
 0x341   :  { %846 = vrot.lane.b32.xlu1 %v1452_v0, %s1094_s27  ;;  %844 = vrot.lane.b32.xlu0 %v790_v60, %s1094_s27  ;;  %v775_v34 = vadd.f32 %v764_v24, %v753_v55  ;;  %v774_v57 = vadd.f32 %v764_v24, %v752_v30  ;;  %v777_v44 = vadd.f32 %v764_v24, %v755_v41 }
 0x342   :  { %v785_v32 = vmax.f32 %v773_v28, 0.0  ;;  %v784_v51 = vmax.f32 %v772_v21, 0.0  ;;  %v776_v39 = vadd.f32 %v764_v24, %v754_v42 }
 0x343   :  { %v787_v48 = vmax.f32 %v775_v34, 0.0  ;;  %v786_v49 = vmax.f32 %v774_v57, 0.0  ;;  %v789_v50 = vmax.f32 %v777_v44, 0.0 }
 0x344   :  { %v797_v20 = vmul.f32 %v785_v32, %v1368_v63  ;;  %v796_v46 = vmul.f32 %v784_v51, %v1366_v62  ;;  %v788_v52 = vmax.f32 %v776_v39, 0.0  ;;  %v924_v62 = vmax.f32 %v1078_v33, 0.0 }
 0x345   :  { %850 = vrot.lane.b32.xlu1 %v793_v11, %s1094_s27  ;;  %848 = vrot.lane.b32.xlu0 %v792_v2, %s1094_s27  ;;  %v799_v18 = vmul.f32 %v787_v48, %v1392_v47  ;;  %v798_v12 = vmul.f32 %v786_v49, %v1386_v10  ;;  %v917_v63 = vmax.f32 %v1077_v40, 0.0  ;;  %v801_v53 = vmul.f32 %v789_v50, %v1398_v26 }
 0x346   :  { %v800_v54 = vmul.f32 %v788_v52, %v1390_v22 }
 0x347   :  { %v1079_v38 = vpack.i.bf16 %v924_v62, %v917_v63 }
 0x349   :  { %854 = vrot.lane.b32.xlu1 %v795_v1, %s1094_s27  ;;  %852 = vrot.lane.b32.xlu0 %v794_v27, %s1094_s27 }
 0x34d   :  { %860 = vrot.lane.b32.xlu0 %v797_v20, %s1094_s27  ;;  %858 = vrot.lane.b32.xlu1 %v796_v46, %s1094_s27 }
 0x351   :  { %864 = vrot.lane.b32.xlu0 %v799_v18, %s1094_s27  ;;  %862 = vrot.lane.b32.xlu1 %v798_v12, %s1094_s27 }
 0x355   :  { %868 = vrot.lane.b32.xlu0 %v801_v53, %s1094_s27  ;;  %866 = vrot.lane.b32.xlu1 %v800_v54, %s1094_s27 }
 0x359   :  { %1080 = vrot.lane.b32.xlu1 %v1079_v38, %s1096_s29 }
 0x3b3   :  { %v847_v10 = vpop.permute.xlu1 %846  ;;  %v845_v47 = vpop.permute.xlu0 %844 }
 0x3b4   :  { %v873_v56 = vsel %vm178_vm5, %v845_v47, %v847_v10 }
 0x3b5   :  { %v897_v58 = vmax.f32 %v790_v60, %v873_v56 }
 0x3b7   :  { %v851_v59 = vpop.permute.xlu1 %850  ;;  %v849_v31 = vpop.permute.xlu0 %848  ;;  %939 = vrot.lane.b32.xlu1 %v897_v58, %s1096_s29 }
 0x3b8   :  { %v874_v26 = vsel %vm178_vm5, %v847_v10, %v849_v31  ;;  %v875_v22 = vsel %vm178_vm5, %v849_v31, %v851_v59 }
 0x3b9   :  { %v898_v61 = vmax.f32 %v1452_v0, %v874_v26  ;;  %v899_v35 = vmax.f32 %v792_v2, %v875_v22 }
 0x3bb   :  { %v855_v3 = vpop.permute.xlu1 %854  ;;  %941 = vrot.lane.b32.xlu0 %v898_v61, %s1096_s29  ;;  %v853_v5 = vpop.permute.xlu0 %852  ;;  %943 = vrot.lane.b32.xlu1 %v899_v35, %s1096_s29 }
 0x3bc   :  { %v876_v4 = vsel %vm178_vm5, %v851_v59, %v853_v5  ;;  %v877_v6 = vsel %vm178_vm5, %v853_v5, %v855_v3  ;;  %v878_v16 = vsel %vm178_vm5, %v855_v3, %v1077_v40 }
 0x3bd   :  { %v900_v7 = vmax.f32 %v793_v11, %v876_v4  ;;  %v901_v8 = vmax.f32 %v794_v27, %v877_v6  ;;  %v902_v13 = vmax.f32 %v795_v1, %v878_v16 }
 0x3bf   :  { %v859_v9 = vpop.permute.xlu1 %858  ;;  %945 = vrot.lane.b32.xlu0 %v900_v7, %s1096_s29  ;;  %v861_v15 = vpop.permute.xlu0 %860  ;;  %947 = vrot.lane.b32.xlu1 %v901_v8, %s1096_s29 }
 0x3c0   :  { %v879_v14 = vsel %vm178_vm5, %v859_v9, %v861_v15 }
 0x3c1   :  { %v903_v60 = vmax.f32 %v796_v46, %v879_v14 }
 0x3c3   :  { %v863_v17 = vpop.permute.xlu1 %862  ;;  %v865_v36 = vpop.permute.xlu0 %864  ;;  %949 = vrot.lane.b32.xlu0 %v902_v13, %s1096_s29 }
 0x3c4   :  { %v880_v0 = vsel %vm178_vm5, %v861_v15, %v863_v17  ;;  %v881_v19 = vsel %vm178_vm5, %v863_v17, %v865_v36 }
 0x3c5   :  { %v904_v43 = vmax.f32 %v797_v20, %v880_v0  ;;  %v905_v23 = vmax.f32 %v798_v12, %v881_v19 }
 0x3c7   :  { %v867_v24 = vpop.permute.xlu1 %866  ;;  %v869_v29 = vpop.permute.xlu0 %868  ;;  %955 = vrot.lane.b32.xlu1 %v904_v43, %s1096_s29  ;;  %953 = vrot.lane.b32.xlu0 %v903_v60, %s1096_s29 }
 0x3c8   :  { %v882_v37 = vsel %vm178_vm5, %v865_v36, %v867_v24  ;;  %v883_v11 = vsel %vm178_vm5, %v867_v24, %v869_v29  ;;  %v884_v2 = vsel %vm178_vm5, %v869_v29, %v1078_v33 }
 0x3c9   :  { %v906_v25 = vmax.f32 %v799_v18, %v882_v37  ;;  %v907_v28 = vmax.f32 %v800_v54, %v883_v11  ;;  %v908_v21 = vmax.f32 %v801_v53, %v884_v2 }
 0x3cb   :  { %959 = vrot.lane.b32.xlu1 %v906_v25, %s1096_s29  ;;  %957 = vrot.lane.b32.xlu0 %v905_v23, %s1096_s29  ;;  %v1081_v55 = vpop.permute.xlu1 %1080 }
 0x3cc   :  { %v1082_v46 = vunpack.i.l.bf16 %v1081_v55  ;;  %v1083_v56 = vunpack.i.h.bf16 %v1081_v55 }
 0x3cf   :  { %963 = vrot.lane.b32.xlu1 %v908_v21, %s1096_s29  ;;  %961 = vrot.lane.b32.xlu0 %v907_v28, %s1096_s29 }
 0x429   :  { %v940_v30 = vpop.permute.xlu1 %939 }
 0x42d   :  { %v942_v1 = vpop.permute.xlu0 %941  ;;  %v944_v27 = vpop.permute.xlu1 %943 }
 0x42e   :  { %v968_v32 = vsel %vm244_vm7, %v940_v30, %v942_v1  ;;  %v969_v51 = vsel %vm244_vm7, %v942_v1, %v944_v27 }
 0x42f   :  { %v992_v34 = vmax.f32 %v897_v58, %v968_v32  ;;  %v993_v57 = vmax.f32 %v898_v61, %v969_v51 }
 0x431   :  { %1004 = vst [vmem:[%s1566_s4] sm:$0xff] %v992_v34  ;;  %1005 = vst [vmem:[%s1566_s4 + $0x8] sm:$0xff] %v993_v57  ;;  %v946_v41 = vpop.permute.xlu0 %945  ;;  %v948_v42 = vpop.permute.xlu1 %947 }
 0x432   :  { %v970_v44 = vsel %vm244_vm7, %v944_v27, %v946_v41  ;;  %v971_v39 = vsel %vm244_vm7, %v946_v41, %v948_v42 }
 0x433   :  { %v994_v45 = vmax.f32 %v899_v35, %v970_v44  ;;  %v995_v20 = vmax.f32 %v900_v7, %v971_v39 }
 0x435   :  { %1006 = vst [vmem:[%s1566_s4 + $0x10] sm:$0xff] %v994_v45  ;;  %1007 = vst [vmem:[%s1566_s4 + $0x18] sm:$0xff] %v995_v20  ;;  %v950_v48 = vpop.permute.xlu0 %949 }
 0x436   :  { %v972_v49 = vsel %vm244_vm7, %v948_v42, %v950_v48  ;;  %v973_v33 = vsel %vm244_vm7, %v950_v48, %v1082_v46 }
 0x437   :  { %v996_v40 = vmax.f32 %v901_v8, %v972_v49  ;;  %v997_v18 = vmax.f32 %v902_v13, %v973_v33 }
 0x439   :  { %1008 = vst [vmem:[%s1566_s4 + $0x20] sm:$0xff] %v996_v40  ;;  %1009 = vst [vmem:[%s1566_s4 + $0x28] sm:$0xff] %v997_v18  ;;  %v956_v12 = vpop.permute.xlu1 %955  ;;  %v954_v50 = vpop.permute.xlu0 %953 }
 0x43a   :  { %v974_v52 = vsel %vm244_vm7, %v954_v50, %v956_v12 }
 0x43b   :  { %v998_v62 = vmax.f32 %v903_v60, %v974_v52 }
 0x43d   :  { %1010 = vst [vmem:[%s1566_s4 + $0x30] sm:$0xff] %v998_v62  ;;  %v960_v63 = vpop.permute.xlu1 %959  ;;  %v958_v53 = vpop.permute.xlu0 %957 }
 0x43e   :  { %v975_v54 = vsel %vm244_vm7, %v956_v12, %v958_v53  ;;  %v976_v38 = vsel %vm244_vm7, %v958_v53, %v960_v63 }
 0x43f   :  { %v999_v10 = vmax.f32 %v904_v43, %v975_v54  ;;  %v1000_v47 = vmax.f32 %v905_v23, %v976_v38 }
 0x441   :  { %1011 = vst [vmem:[%s1566_s4 + $0x38] sm:$0xff] %v999_v10  ;;  %1012 = vst [vmem:[%s1566_s4 + $0x40] sm:$0xff] %v1000_v47  ;;  %v964_v58 = vpop.permute.xlu1 %963  ;;  %v962_v59 = vpop.permute.xlu0 %961 }
 0x442   :  { %v979_v31 = vsel %vm244_vm7, %v964_v58, %v1083_v56  ;;  %v977_v26 = vsel %vm244_vm7, %v960_v63, %v962_v59  ;;  %v978_v22 = vsel %vm244_vm7, %v962_v59, %v964_v58 }
 0x443   :  { %v1003_v61 = vmax.f32 %v908_v21, %v979_v31  ;;  %v1001_v35 = vmax.f32 %v906_v25, %v977_v26  ;;  %v1002_v3 = vmax.f32 %v907_v28, %v978_v22 }
 0x445   :  { %1015 = vst [vmem:[%s1566_s4 + $0x58] sm:$0xff] %v1003_v61  ;;  %1013 = vst [vmem:[%s1566_s4 + $0x48] sm:$0xff] %v1001_v35 }
 0x446   :  { %1014 = vst [vmem:[%s1566_s4 + $0x50] sm:$0xff] %v1002_v3 }

</bundles_post_ra>
